<compile_context>
chip_gen: v5e
topology: v5e:2x2
jax: 0.10.0
libtpu: 0.0.40
codegen_flags: <defaults>
</compile_context>

<pallas_src>
import jax
import jax.numpy as jnp
from jax.experimental import pallas as pl
from jax.experimental.pallas import tpu as pltpu

BIT = 4
QN = float(-(2 ** (BIT - 1)))      # -8
QP = float(2 ** (BIT - 1) - 1)     # +7


def _round_up(x, m):
    return (x + m - 1) // m * m


def quantize_kernel(x_ref, alpha_ref, codes_ref):
    """Elementwise pre-pass: 4-bit LSQ codes = clamp(round(x / alpha), Qn, Qp).

    Matches the reference bit-exactly (same divide + round).  Codes are small
    integers, exact in bf16 -> halves the x-side bytes fed to stage 1."""
    codes = jnp.clip(jnp.round(x_ref[...] / alpha_ref[...]), QN, QP)
    codes_ref[...] = codes.astype(codes_ref.dtype)


def quant_matmul_kernel(codes_ref, w_ref, y_ref):
    """Stage 1: y = codes @ (alpha.T * W), grid (node, out-feat, in-feat).

    bf16 x bf16 -> f32 MXU path; accumulates directly into the resident f32
    output block (no VMEM scratch, no epilogue copy)."""
    @pl.when(pl.program_id(2) == 0)
    def _():
        y_ref[...] = jnp.zeros_like(y_ref)

    y_ref[...] += jnp.dot(codes_ref[...], w_ref[...],
                          preferred_element_type=jnp.float32)


def aggregate_update_kernel(a_ref, y_ref, b_ref, out_ref):
    """Stage 2: out = A_aug @ y + b, grid (dst-node, out-feat, src-node).

    A_aug already carries the (1+eps) diagonal (identity term), so the whole
    GIN update is a single bf16 MXU contraction; bias added on the last
    reduction step only."""
    @pl.when(pl.program_id(2) == 0)
    def _():
        out_ref[...] = jnp.zeros_like(out_ref)

    out_ref[...] += jnp.dot(a_ref[...], y_ref[...],
                            preferred_element_type=jnp.float32)

    @pl.when(pl.program_id(2) == pl.num_programs(2) - 1)
    def _():
        out_ref[...] += b_ref[...]


def gin_conv_multi_quant_v2(x, edge_index, bit_sum, alpha, w, b, eps=0.0,
                            *, node_tile=512, feat_tile=512, out_tile=512):
    """Wrapper: fold constants, pad to lane-dense/tileable shapes, build the
    self-loop-free augmented adjacency in plain JAX (glue), run the three
    Pallas kernels (quantize, feature matmul, aggregate+update)."""
    N, F = x.shape
    H = w.shape[1]

    # Large tiles to fill the 256x256 MXU / amortize grid-step overhead, but
    # clamped to the lane-aligned problem size so small graphs don't over-pad.
    tn = min(node_tile, _round_up(N, 128))
    tf = min(feat_tile, _round_up(F, 128))
    th = min(out_tile, _round_up(H, 128))
    Np, Fp, Hp = _round_up(N, tn), _round_up(F, tf), _round_up(H, th)

    # ---- wrapper-side folding (done once, in XLA) --------------------------
    # Padded alpha = 1 keeps the in-kernel divide finite; padded x rows/cols
    # are zero, so padded codes / y / out rows are zero (exact).
    x_p = jnp.zeros((Np, Fp), jnp.float32).at[:N, :F].set(x)
    alpha_p = jnp.ones((1, Fp), jnp.float32).at[:, :F].set(alpha)

    # Fold alpha into the weights: (codes * alpha) @ W == codes @ (alpha.T * W)
    w_scaled = jnp.zeros((Fp, Hp), jnp.float32).at[:F, :H].set(
        alpha.reshape(F, 1) * w)
    w_scaled = w_scaled.astype(jnp.bfloat16)
    b_p = jnp.zeros((1, Hp), jnp.float32).at[:, :H].set(b)

    # remove_self_loops + dense scatter-add adjacency (aggr='add'), with the
    # GIN identity term (1+eps) folded into the diagonal.  Entries are small
    # integer edge multiplicities (+1+eps) -> exact in bf16; bf16 halves the
    # dominant O(N^2) HBM stream of stage 2 (int8 A would help further on
    # v5e/v6e but v7x has no MXU int path, so bf16 is the portable choice).
    src = edge_index[0]                    # x_j index (flow='source_to_target')
    dst = edge_index[1]                    # scatter index (edge_index_i)
    keep = (src != dst).astype(jnp.float32)
    A = jnp.zeros((Np, Np), jnp.float32).at[dst, src].add(keep)
    diag = jnp.arange(Np)
    A = A.at[diag, diag].add(1.0 + eps)
    A = A.astype(jnp.bfloat16)

    sem2 = pltpu.CompilerParams(dimension_semantics=("parallel", "parallel"))
    sem3 = pltpu.CompilerParams(
        dimension_semantics=("parallel", "parallel", "arbitrary"))

    # ---- pre-pass: bf16 quantization codes (computed once per element) -----
    codes = pl.pallas_call(
        quantize_kernel,
        out_shape=jax.ShapeDtypeStruct((Np, Fp), jnp.bfloat16),
        grid_spec=pltpu.PrefetchScalarGridSpec(
            num_scalar_prefetch=0,
            grid=(Np // tn, Fp // tf),
            in_specs=[
                pl.BlockSpec((tn, tf), lambda i, k: (i, k)),   # x
                pl.BlockSpec((1, tf), lambda i, k: (0, k)),    # alpha
            ],
            out_specs=pl.BlockSpec((tn, tf), lambda i, k: (i, k))),
        compiler_params=sem2,
    )(x_p, alpha_p)

    # ---- stage 1: y = codes @ w_scaled   (== q_xw(x) @ W) ------------------
    y = pl.pallas_call(
        quant_matmul_kernel,
        out_shape=jax.ShapeDtypeStruct((Np, Hp), jnp.float32),
        grid_spec=pltpu.PrefetchScalarGridSpec(
            num_scalar_prefetch=0,
            grid=(Np // tn, Hp // th, Fp // tf),
            in_specs=[
                pl.BlockSpec((tn, tf), lambda i, j, k: (i, k)),   # codes
                pl.BlockSpec((tf, th), lambda i, j, k: (k, j)),   # w_scaled
            ],
            out_specs=pl.BlockSpec((tn, th), lambda i, j, k: (i, j))),
        compiler_params=sem3,
    )(codes, w_scaled)

    # bf16 y for the stage-2 MXU path / halved HBM stream (accum stays f32).
    y_bf16 = y.astype(jnp.bfloat16)

    # ---- stage 2: out = A_aug @ y + b  (== ((1+eps)*xq + A@xq) @ W + b) ----
    out_p = pl.pallas_call(
        aggregate_update_kernel,
        out_shape=jax.ShapeDtypeStruct((Np, Hp), jnp.float32),
        grid_spec=pltpu.PrefetchScalarGridSpec(
            num_scalar_prefetch=0,
            grid=(Np // tn, Hp // th, Np // tn),
            in_specs=[
                pl.BlockSpec((tn, tn), lambda i, j, k: (i, k)),   # A_aug
                pl.BlockSpec((tn, th), lambda i, j, k: (k, j)),   # y (source)
                pl.BlockSpec((1, th), lambda i, j, k: (0, j)),    # bias
            ],
            out_specs=pl.BlockSpec((tn, th), lambda i, j, k: (i, j))),
        compiler_params=sem3,
    )(A, y_bf16, b_p)

    # TODO(synk): `bit_sum` is an opaque accumulator consumed/updated by the
    # user-supplied `nn`; the synthesized Linear `nn` here passes it through.
    return out_p[:N, :H], bit_sum


def _reference(x, edge_index, alpha, w, b, eps=0.0):
    """Plain-JAX f32 reference matching the PyTorch forward semantics."""
    xq = jnp.clip(jnp.round(x / alpha), QN, QP) * alpha
    src, dst = edge_index[0], edge_index[1]
    keep = (src != dst).astype(jnp.float32)
    msg = xq[src] * keep[:, None]
    aggr = jnp.zeros_like(xq).at[dst].add(msg)
    h = (1.0 + eps) * xq + aggr
    return h @ w + b


if __name__ == "__main__":
    key = jax.random.PRNGKey(0)
    k1, k2, k3, k4 = jax.random.split(key, 4)

    N, F, H, E = 16, 64, 64, 48            # nodes, in-feats, out-feats, edges
    x = jax.random.normal(k1, (N, F), dtype=jnp.float32)
    edge_index = jax.random.randint(k2, (2, E), 0, N, dtype=jnp.int32)
    bit_sum = jnp.zeros((), jnp.float32)

    # deterministic parameter init (synthetic, not a checkpoint load)
    # quantizer alpha ~ alpha_init + alpha_std * N(0,1), kept strictly positive
    alpha = jnp.abs(0.01 + 0.01 * jax.random.normal(k3, (1, F), jnp.float32)) + 1e-3
    w = jax.random.normal(k4, (F, H), jnp.float32) / jnp.sqrt(float(F))
    b = jnp.zeros((1, H), jnp.float32)

    out, bs = gin_conv_multi_quant_v2(x, edge_index, bit_sum, alpha, w, b, eps=0.0)
    out = jax.block_until_ready(out)

    ref = _reference(x, edge_index, alpha, w, b, eps=0.0)
    # Tolerance: the quantization codes and adjacency are exact, but the
    # bf16-cast weights (alpha*W) and bf16 y stream introduce ~2^-9 relative
    # rounding per term (f32 accumulation); the observed error is O(1e-3),
    # so validate at 1e-2 as recommended by the review.
    assert jnp.allclose(out, ref, rtol=1e-2, atol=1e-2), "mismatch vs reference"

    print("KERNEL_OK")
</pallas_src>

<mosaic_0001>
module attributes {stable_mosaic.version = 11 : i64} {
  func.func @quantize_kernel(%arg0: i32, %arg1: i32, %arg2: memref<128x128xf32, #tpu.memory_space<vmem>>, %arg3: memref<1x128xf32, #tpu.memory_space<vmem>>, %arg4: memref<128x128xbf16, #tpu.memory_space<vmem>>) attributes {dimension_semantics = [#tpu.dimension_semantics<parallel>, #tpu.dimension_semantics<parallel>], iteration_bounds = array<i64: 1, 1>, scalar_prefetch = 0 : i64, scratch_operands = 0 : i64, tpu.core_type = #tpu.core_type<tc>, window_params = [{transform_indices = @transform_0, window_bounds = array<i64: 128, 128>}, {transform_indices = @transform_1, window_bounds = array<i64: 1, 128>}, {transform_indices = @transform_2, window_bounds = array<i64: 128, 128>}]} {
    %c0 = arith.constant 0 : index
    %c0_0 = arith.constant 0 : index
    %0 = vector.load %arg2[%c0, %c0_0] : memref<128x128xf32, #tpu.memory_space<vmem>>, vector<128x128xf32>
    %c0_1 = arith.constant 0 : index
    %c0_2 = arith.constant 0 : index
    %1 = vector.load %arg3[%c0_1, %c0_2] : memref<1x128xf32, #tpu.memory_space<vmem>>, vector<1x128xf32>
    %2 = vector.broadcast %1 : vector<1x128xf32> to vector<128x128xf32>
    %3 = arith.divf %0, %2 : vector<128x128xf32>
    %4 = math.roundeven %3 : vector<128x128xf32>
    %cst = arith.constant -8.000000e+00 : f32
    %cst_3 = arith.constant 7.000000e+00 : f32
    %5 = vector.broadcast %cst : f32 to vector<128x128xf32>
    %6 = arith.maximumf %5, %4 : vector<128x128xf32>
    %7 = vector.broadcast %cst_3 : f32 to vector<128x128xf32>
    %8 = arith.minimumf %7, %6 : vector<128x128xf32>
    %9 = arith.truncf %8 : vector<128x128xf32> to vector<128x128xbf16>
    %c0_4 = arith.constant 0 : index
    %c0_5 = arith.constant 0 : index
    %10 = vector.load %arg4[%c0_4, %c0_5] : memref<128x128xbf16, #tpu.memory_space<vmem>>, vector<128x128xbf16>
    tpu.vector_store %arg4[%c0_4, %c0_5], %9 {strides = array<i32>} : memref<128x128xbf16, #tpu.memory_space<vmem>>, vector<128x128xbf16>,
    return
  }
  func.func @transform_0(%arg0: i32, %arg1: i32) -> (i32, i32) {
    %c0_i32 = arith.constant 0 : i32
    return %arg0, %arg1 : i32, i32
  }
  func.func @transform_1(%arg0: i32, %arg1: i32) -> (i32, i32) {
    %c0_i32 = arith.constant 0 : i32
    %c0_i32_0 = arith.constant 0 : i32
    return %c0_i32, %arg1 : i32, i32
  }
  func.func @transform_2(%arg0: i32, %arg1: i32) -> (i32, i32) {
    %c0_i32 = arith.constant 0 : i32
    return %arg0, %arg1 : i32, i32
  }
}

</mosaic_0001>

<bundles_post_ra>
// kernel: tpu_custom_call.1
= control target key start
LH: loop header
LB: loop body
LE: loop exit
PB: predicated region body
PF: predicated region fallthrough
CT: control target
= control target key end

     0   :  { %7 = vsyncpa [#allocation3], 0  ;;  %s600_s0 = inlined_call_operand.hbm [shape: f32[128,128], index: 0, kind: input, shape index: {}]   ;;  %s601_s1 = inlined_call_operand.hbm [shape: f32[1,128], index: 1, kind: input, shape index: {}]   ;;  %s602_s2 = inlined_call_operand.hbm [shape: bf16[128,128], index: 2, kind: output, shape index: {}]  }
   0x1   :  { %8 = vsyncpa [#allocation6], 0 }
   0x2   :  { %9 = vsyncpa [#allocation4], 0  ;;  %s14_s11 = sshll.u32 %s600_s0, 4  ;;  %s455_s12 = smov [#allocation2]   ;;  %s15_s11 = int_to_ptr.hbm [resolvable:$true] %s14_s11 }
   0x3   :  { %s16_s13 = sshll.u32 %s455_s12, 4  ;;  %s28_s16 = sshll.u32 %s601_s1, 4  ;;  %s17_s13 = int_to_ptr.vmem [resolvable:$true] %s16_s13  ;;  %s29_s16 = int_to_ptr.hbm [resolvable:$true] %s28_s16 }
   0x4   :  { %s456_s17 = smov 128   ;;  %s457_s18 = smov 8  }
   0x5   :  { %22 = dma.hbm_to_vmem [thread:$0]  %s15_s11, 2048, %s17_s13, [#allocation3], %s456_s17, %s456_s17, %s457_s18  }
   0x6   :  { %s458_s19 = smov [#allocation5]  }
   0x7   :  { %s30_s20 = sshll.u32 %s458_s19, 4  ;;  %s31_s20 = int_to_ptr.vmem [resolvable:$true] %s30_s20 }
   0x8   :  { %33 = dma.hbm_to_vmem [thread:$0]  %s29_s16, 16, %s31_s20, [#allocation6]  }
   0x9   :  { %449 = dma.done.wait [#allocation3], 2048  }
   0xa   :  { %450 = vsyncadd [#allocation3], 4294965248 }
   0xb   :  { %451 = dma.done.wait [#allocation6], 16  }
   0xc   :  { %452 = vsyncadd [#allocation6], 4294967280  ;;  %v374_v0 = vld [vmem:[#allocation5] ss:$0 sm:$0xff]  ;;  %v43_v10 = vld [vmem:[#allocation2 + $0x8] sm:$0xff]  ;;  %s459_s0 = smov [#allocation7]  }
   0xd   :  { %375 = vrcp.f32 %v374_v0  ;;  %v73_v3 = vand.u32 2147483648, %v374_v0  ;;  %vm67_vm0 = vweird.f32 %v374_v0  ;;  %v71_v5 = vand.u32 2147483647, %v374_v0  ;;  %v42_v8 = vld [vmem:[#allocation2] sm:$0xff]  ;;  %v44_v11 = vld [vmem:[#allocation2 + $0x10] sm:$0xff]  ;;  %v45_v12 = vld [vmem:[#allocation2 + $0x18] sm:$0xff] }
   0xe   :  { %v46_v14 = vld [vmem:[#allocation2 + $0x20] sm:$0xff]  ;;  %v47_v15 = vld [vmem:[#allocation2 + $0x28] sm:$0xff]  ;;  %v48_v16 = vld [vmem:[#allocation2 + $0x30] sm:$0xff]  ;;  %s176_s1 = sshll.u32 %s459_s0, 4  ;;  %s178_s23 = sshll.u32 %s602_s2, 4  ;;  %s177_s1 = int_to_ptr.vmem [resolvable:$true] %s176_s1  ;;  %s179_s23 = int_to_ptr.hbm [resolvable:$true] %s178_s23 }
   0xf   :  { %v74_v7 = vor.u32 1.1754944e-38, %v73_v3  ;;  %vm72_vm3 = vcmp.eq.f32.partialorder %v71_v5, 8.507059e+37  ;;  %v49_v18 = vld [vmem:[#allocation2 + $0x38] sm:$0xff]  ;;  %s460_s24 = smov 64   ;;  %s461_s25 = smov 4  }
  0x13   :  { %v376_v1 = vpop.eup %375 }
  0x14   :  { %v63_v2 = vmul.f32 %v376_v1, %v374_v0  ;;  %vm68_vm1 = vweird.f32 %v376_v1 }
  0x15   :  { %vm69_vm2 = vmor %vm67_vm0, %vm68_vm1 }
  0x16   :  { %v64_v4 = vsub.f32 1.0, %v63_v2 }
  0x18   :  { %v65_v6 = vmul.f32 %v376_v1, %v64_v4 }
  0x1a   :  { %v66_v9 = vadd.f32 %v376_v1, %v65_v6 }
  0x1c   :  { %v70_v13 = vsel %vm69_vm2, %v376_v1, %v66_v9 }
  0x1d   :  { %v483_v17 = vsel %vm72_vm3, %v74_v7, %v70_v13 }
  0x1e   :  { %v76_v19 = vmul.f32 %v483_v17, %v42_v8  ;;  %v77_v20 = vmul.f32 %v483_v17, %v43_v10  ;;  %v78_v21 = vmul.f32 %v483_v17, %v44_v11  ;;  %v79_v22 = vmul.f32 %v483_v17, %v45_v12 }
  0x1f   :  { %v80_v23 = vmul.f32 %v483_v17, %v46_v14  ;;  %v491_v24 = vmul.f32 %v483_v17, %v47_v15  ;;  %v494_v25 = vmul.f32 %v483_v17, %v48_v16  ;;  %v497_v29 = vmul.f32 %v483_v17, %v49_v18 }
  0x20   :  { %v239_v26 = vand.u32 2147483647, %v76_v19  ;;  %v241_v27 = vcvt.f32.s32 %v76_v19  ;;  %v247_v28 = vand.u32 2147483647, %v77_v20  ;;  %v244_v30 = vand.u32 2147483648, %v76_v19 }
  0x21   :  { %v249_v31 = vcvt.f32.s32 %v77_v20  ;;  %v255_v32 = vand.u32 2147483647, %v78_v21  ;;  %v257_v33 = vcvt.f32.s32 %v78_v21  ;;  %v252_v37 = vand.u32 2147483648, %v77_v20 }
  0x22   :  { %vm499_vm4 = vcmp.lt.f32.partialorder %v239_v26, 8388608.0  ;;  %v242_v35 = vcvt.s32.f32 %v241_v27  ;;  %vm503_vm5 = vcmp.lt.f32.partialorder %v247_v28, 8388608.0  ;;  %v260_v40 = vand.u32 2147483648, %v78_v21 }
  0x23   :  { %v250_v38 = vcvt.s32.f32 %v249_v31  ;;  %v258_v39 = vcvt.s32.f32 %v257_v33  ;;  %v263_v41 = vand.u32 2147483647, %v79_v22  ;;  %vm507_vm6 = vcmp.lt.f32.partialorder %v255_v32, 8388608.0  ;;  %v51_v32 = vld [vmem:[#allocation2 + $0x48] sm:$0xff] }
  0x24   :  { %v243_v42 = vand.u32 2147483647, %v242_v35  ;;  %v265_v44 = vcvt.f32.s32 %v79_v22  ;;  %v271_v45 = vand.u32 2147483647, %v80_v23  ;;  %v268_v48 = vand.u32 2147483648, %v79_v22 }
  0x25   :  { %v251_v46 = vand.u32 2147483647, %v250_v38  ;;  %v259_v47 = vand.u32 2147483647, %v258_v39  ;;  %v273_v49 = vcvt.f32.s32 %v80_v23  ;;  %vm511_vm7 = vcmp.lt.f32.partialorder %v263_v41, 8388608.0 }
  0x26   :  { %v245_v50 = vor.u32 %v244_v30, %v243_v42  ;;  %v266_v52 = vcvt.s32.f32 %v265_v44  ;;  %v276_v53 = vand.u32 2147483648, %v80_v23  ;;  %v279_v57 = vand.u32 2147483647, %v491_v24 }
  0x27   :  { %v253_v54 = vor.u32 %v252_v37, %v251_v46  ;;  %v261_v55 = vor.u32 %v260_v40, %v259_v47  ;;  %v274_v56 = vcvt.s32.f32 %v273_v49  ;;  %vm518_vm8 = vcmp.lt.f32.partialorder %v271_v45, 8388608.0  ;;  %v52_v40 = vld [vmem:[#allocation2 + $0x50] sm:$0xff]  ;;  %v53_v49 = vld [vmem:[#allocation2 + $0x58] sm:$0xff] }
  0x28   :  { %v246_v58 = vsel %vm499_vm4, %v245_v50, %v76_v19  ;;  %v267_v59 = vand.u32 2147483647, %v266_v52  ;;  %v281_v61 = vcvt.f32.s32 %v491_v24  ;;  %v284_v5 = vand.u32 2147483648, %v491_v24  ;;  %v50_v19 = vld [vmem:[#allocation2 + $0x40] sm:$0xff] }
  0x29   :  { %v254_v62 = vsel %vm503_vm5, %v253_v54, %v77_v20  ;;  %v108_v63 = vmax.f32 %v246_v58, -8.0  ;;  %v262_v0 = vsel %vm507_vm6, %v261_v55, %v78_v21  ;;  %v275_v1 = vand.u32 2147483647, %v274_v56 }
  0x2a   :  { %v109_v2 = vmax.f32 %v254_v62, -8.0  ;;  %v269_v3 = vor.u32 %v268_v48, %v267_v59  ;;  %v110_v4 = vmax.f32 %v262_v0, -8.0  ;;  %vm528_vm9 = vcmp.lt.f32.partialorder %v279_v57, 8388608.0 }
  0x2b   :  { %v124_v6 = vmin.f32 %v108_v63, 7.0  ;;  %v277_v7 = vor.u32 %v276_v53, %v275_v1  ;;  %v282_v9 = vcvt.s32.f32 %v281_v61  ;;  %v287_v12 = vand.u32 2147483647, %v494_v25 }
  0x2c   :  { %v125_v10 = vmin.f32 %v109_v2, 7.0  ;;  %v270_v11 = vsel %vm511_vm7, %v269_v3, %v79_v22  ;;  %v289_v13 = vcvt.f32.s32 %v494_v25  ;;  %v126_v15 = vmin.f32 %v110_v4, 7.0 }
  0x2d   :  { %v111_v14 = vmax.f32 %v270_v11, -8.0  ;;  %v278_v16 = vsel %vm518_vm8, %v277_v7, %v80_v23  ;;  %v283_v18 = vand.u32 2147483647, %v282_v9  ;;  %v292_v27 = vand.u32 2147483648, %v494_v25  ;;  %v54_v7 = vld [vmem:[#allocation2 + $0x60] sm:$0xff]  ;;  %v55_v11 = vld [vmem:[#allocation2 + $0x68] sm:$0xff] }
  0x2e   :  { %v195_v20 = vpack.c.bf16 %v125_v10, %v124_v6  ;;  %v112_v21 = vmax.f32 %v278_v16, -8.0  ;;  %v290_v26 = vcvt.s32.f32 %v289_v13  ;;  %v295_v22 = vand.u32 2147483647, %v497_v29 }
  0x2f   :  { %v127_v28 = vmin.f32 %v111_v14, 7.0  ;;  %v285_v30 = vor.u32 %v284_v5, %v283_v18  ;;  %v297_v31 = vcvt.f32.s32 %v497_v29  ;;  %vm541_vm10 = vcmp.lt.f32.partialorder %v287_v12, 8388608.0 }
  0x30   :  { %196 = vst [vmem:[#allocation7] sm:$0xff] %v195_v20   ;;  %v128_v33 = vmin.f32 %v112_v21, 7.0  ;;  %v291_v23 = vand.u32 2147483647, %v290_v26  ;;  %v84_v35 = vmul.f32 %v483_v17, %v50_v19  ;;  %v300_v39 = vand.u32 2147483648, %v497_v29  ;;  %v56_v21 = vld [vmem:[#allocation2 + $0x70] sm:$0xff] }
  0x31   :  { %v200_v36 = vpack.c.bf16 %v127_v28, %v126_v15  ;;  %v286_v37 = vsel %vm528_vm9, %v285_v30, %v491_v24  ;;  %v298_v38 = vcvt.s32.f32 %v297_v31  ;;  %v85_v43 = vmul.f32 %v483_v17, %v51_v32 }
  0x32   :  { %v113_v41 = vmax.f32 %v286_v37, -8.0  ;;  %v293_v42 = vor.u32 %v292_v27, %v291_v23  ;;  %v303_v44 = vand.u32 2147483647, %v84_v35  ;;  %vm551_vm11 = vcmp.lt.f32.partialorder %v295_v22, 8388608.0 }
  0x33   :  { %232 = vst [vmem:[#allocation7 + $0x8] sm:$0xff] %v200_v36   ;;  %v299_v46 = vand.u32 2147483647, %v298_v38  ;;  %v305_v47 = vcvt.f32.s32 %v84_v35  ;;  %v308_v48 = vand.u32 2147483648, %v84_v35  ;;  %v311_v51 = vand.u32 2147483647, %v85_v43 }
  0x34   :  { %v129_v50 = vmin.f32 %v113_v41, 7.0  ;;  %v294_v24 = vsel %vm541_vm10, %v293_v42, %v494_v25  ;;  %v86_v52 = vmul.f32 %v483_v17, %v52_v40  ;;  %v313_v56 = vcvt.f32.s32 %v85_v43  ;;  %v57_v40 = vld [vmem:[#allocation2 + $0x78] sm:$0xff] }
  0x35   :  { %v301_v53 = vor.u32 %v300_v39, %v299_v46  ;;  %v114_v54 = vmax.f32 %v294_v24, -8.0  ;;  %v306_v55 = vcvt.s32.f32 %v305_v47  ;;  %vm559_vm12 = vcmp.lt.f32.partialorder %v303_v44, 8388608.0 }
  0x36   :  { %v205_v57 = vpack.c.bf16 %v129_v50, %v128_v33  ;;  %v87_v59 = vmul.f32 %v483_v17, %v53_v49  ;;  %v314_v25 = vcvt.s32.f32 %v313_v56  ;;  %v316_v62 = vand.u32 2147483648, %v85_v43 }
  0x37   :  { %v302_v60 = vsel %vm551_vm11, %v301_v53, %v497_v29  ;;  %v307_v61 = vand.u32 2147483647, %v306_v55  ;;  %v130_v0 = vmin.f32 %v114_v54, 7.0  ;;  %vm567_vm13 = vcmp.lt.f32.partialorder %v311_v51, 8388608.0 }
  0x38   :  { %233 = vst [vmem:[#allocation7 + $0x10] sm:$0xff] %v205_v57   ;;  %v115_v63 = vmax.f32 %v302_v60, -8.0  ;;  %v321_v2 = vcvt.f32.s32 %v86_v52  ;;  %v315_v4 = vand.u32 2147483647, %v314_v25  ;;  %v319_v5 = vand.u32 2147483647, %v86_v52 }
  0x39   :  { %v309_v3 = vor.u32 %v308_v48, %v307_v61  ;;  %v329_v6 = vcvt.f32.s32 %v87_v59  ;;  %v324_v10 = vand.u32 2147483648, %v86_v52  ;;  %v327_v29 = vand.u32 2147483647, %v87_v59 }
  0x3a   :  { %v131_v8 = vmin.f32 %v115_v63, 7.0  ;;  %v322_v9 = vcvt.s32.f32 %v321_v2  ;;  %v317_v13 = vor.u32 %v316_v62, %v315_v4  ;;  %v332_v15 = vand.u32 2147483648, %v87_v59 }
  0x3b   :  { %v310_v12 = vsel %vm559_vm12, %v309_v3, %v84_v35  ;;  %v330_v14 = vcvt.s32.f32 %v329_v6  ;;  %v88_v20 = vmul.f32 %v483_v17, %v54_v7  ;;  %vm576_vm14 = vcmp.lt.f32.partialorder %v319_v5, 8388608.0 }
  0x3c   :  { %v210_v16 = vpack.c.bf16 %v131_v8, %v130_v0  ;;  %v116_v18 = vmax.f32 %v310_v12, -8.0  ;;  %v323_v19 = vand.u32 2147483647, %v322_v9  ;;  %v318_v26 = vsel %vm567_vm13, %v317_v13, %v85_v43 }
  0x3d   :  { %v331_v28 = vand.u32 2147483647, %v330_v14  ;;  %v89_v30 = vmul.f32 %v483_v17, %v55_v11  ;;  %v117_v22 = vmax.f32 %v318_v26, -8.0  ;;  %vm328_vm15 = vcmp.lt.f32.partialorder %v327_v29, 8388608.0 }
  0x3e   :  { %234 = vst [vmem:[#allocation7 + $0x18] sm:$0xff] %v210_v16   ;;  %v132_v31 = vmin.f32 %v116_v18, 7.0  ;;  %v325_v32 = vor.u32 %v324_v10, %v323_v19  ;;  %v335_v34 = vand.u32 2147483647, %v88_v20  ;;  %v337_v23 = vcvt.f32.s32 %v88_v20 }
  0x3f   :  { %v333_v33 = vor.u32 %v332_v15, %v331_v28  ;;  %v90_v35 = vmul.f32 %v483_v17, %v56_v21  ;;  %v133_v36 = vmin.f32 %v117_v22, 7.0  ;;  %v343_v38 = vand.u32 2147483647, %v89_v30 }
  0x40   :  { %v326_v37 = vsel %vm576_vm14, %v325_v32, %v86_v52  ;;  %v345_v39 = vcvt.f32.s32 %v89_v30  ;;  %v338_v43 = vcvt.s32.f32 %v337_v23  ;;  %v340_v44 = vand.u32 2147483648, %v88_v20 }
  0x41   :  { %v334_v41 = vsel %vm328_vm15, %v333_v33, %v87_v59  ;;  %v118_v42 = vmax.f32 %v326_v37, -8.0  ;;  %v215_v45 = vpack.c.bf16 %v133_v36, %v132_v31  ;;  %v348_v48 = vand.u32 2147483648, %v89_v30 }
  0x42   :  { %v119_v46 = vmax.f32 %v334_v41, -8.0  ;;  %v346_v47 = vcvt.s32.f32 %v345_v39  ;;  %vm584_vm0 = vcmp.lt.f32.partialorder %v335_v34, 8388608.0  ;;  %v339_v24 = vand.u32 2147483647, %v338_v43 }
  0x43   :  { %v134_v49 = vmin.f32 %v118_v42, 7.0  ;;  %v91_v51 = vmul.f32 %v483_v17, %v57_v40  ;;  %235 = vst [vmem:[#allocation7 + $0x20] sm:$0xff] %v215_v45   ;;  %vm589_vm1 = vcmp.lt.f32.partialorder %v343_v38, 8388608.0  ;;  %v353_v55 = vcvt.f32.s32 %v90_v35 }
  0x44   :  { %v135_v52 = vmin.f32 %v119_v46, 7.0  ;;  %v347_v54 = vand.u32 2147483647, %v346_v47  ;;  %v341_v56 = vor.u32 %v340_v44, %v339_v24  ;;  %v351_v57 = vand.u32 2147483647, %v90_v35 }
  0x45   :  { %v356_v58 = vand.u32 2147483648, %v90_v35  ;;  %v361_v59 = vcvt.f32.s32 %v91_v51  ;;  %v354_v25 = vcvt.s32.f32 %v353_v55  ;;  %v359_v62 = vand.u32 2147483647, %v91_v51 }
  0x46   :  { %v220_v60 = vpack.c.bf16 %v135_v52, %v134_v49  ;;  %v349_v61 = vor.u32 %v348_v48, %v347_v54  ;;  %v342_v63 = vsel %vm584_vm0, %v341_v56, %v88_v20  ;;  %v364_v0 = vand.u32 2147483648, %v91_v51 }
  0x47   :  { %v362_v17 = vcvt.s32.f32 %v361_v59  ;;  %v120_v2 = vmax.f32 %v342_v63, -8.0  ;;  %v355_v3 = vand.u32 2147483647, %v354_v25  ;;  %vm352_vm2 = vcmp.lt.f32.partialorder %v351_v57, 8388608.0 }
  0x48   :  { %236 = vst [vmem:[#allocation7 + $0x28] sm:$0xff] %v220_v60   ;;  %v350_v1 = vsel %vm589_vm1, %v349_v61, %v89_v30  ;;  %vm360_vm3 = vcmp.lt.f32.partialorder %v359_v62, 8388608.0 }
  0x49   :  { %v121_v4 = vmax.f32 %v350_v1, -8.0  ;;  %v363_v5 = vand.u32 2147483647, %v362_v17  ;;  %v136_v6 = vmin.f32 %v120_v2, 7.0  ;;  %v357_v7 = vor.u32 %v356_v58, %v355_v3 }
  0x4b   :  { %v137_v8 = vmin.f32 %v121_v4, 7.0  ;;  %v365_v9 = vor.u32 %v364_v0, %v363_v5  ;;  %v358_v10 = vsel %vm352_vm2, %v357_v7, %v90_v35 }
  0x4c   :  { %v122_v12 = vmax.f32 %v358_v10, -8.0 }
  0x4d   :  { %v225_v29 = vpack.c.bf16 %v137_v8, %v136_v6  ;;  %v366_v11 = vsel %vm360_vm3, %v365_v9, %v91_v51 }
  0x4e   :  { %v123_v13 = vmax.f32 %v366_v11, -8.0  ;;  %v138_v14 = vmin.f32 %v122_v12, 7.0 }
  0x4f   :  { %237 = vst [vmem:[#allocation7 + $0x30] sm:$0xff] %v225_v29  }
  0x50   :  { %v139_v15 = vmin.f32 %v123_v13, 7.0 }
  0x52   :  { %v230_v16 = vpack.c.bf16 %v139_v15, %v138_v14 }
  0x54   :  { %238 = vst [vmem:[#allocation7 + $0x38] sm:$0xff] %v230_v16  }
  0x55   :  { %184 = dma.vmem_to_hbm [thread:$0]  %s177_s1, 1024, %s179_s23, [#allocation4], %s460_s24, %s460_s24, %s461_s25  }
  0x56   :  { %453 = dma.done.wait [#allocation4], 1024  }
  0x57   :  { %454 = vsyncadd [#allocation4], 4294966272 }
  0x58   :  { %189 = vsyncpa [#allocation3], 1 }
  0x59   :  { %190 = vsyncpa [#allocation6], 1 }
  0x5a   :  { %191 = vsyncpa [#allocation4], 1 }

</bundles_post_ra>
